<compile_context>
chip_gen: v7x
topology: tpu7x:2x2x1
jax: 0.10.0
libtpu: 0.0.40
codegen_flags: <defaults>
</compile_context>

<pallas_src>
import functools

import jax
import jax.numpy as jnp
from jax.experimental import pallas as pl
from jax.experimental.pallas import tpu as pltpu


def _round_up(x, m):
    return (x + m - 1) // m * m


def _c51_head_kernel(x_ref, w1_ref, b1_ref, w2_ref, b2_ref, out_ref):
    # stage 1:  h = relu(x @ W1 + b1)                     (TB, 512), f32 bias/ReLU
    h = jnp.dot(x_ref[...], w1_ref[...], preferred_element_type=jnp.float32)
    h = jnp.maximum(h + b1_ref[...], 0.0)

    # stage 2 (q_head + value_head + dueling combine folded into one GEMM,
    # columns zero-padded to a full 128-lane slab):
    #   out = h @ W2 + b2                                 (TB, 128)
    y = jnp.dot(h.astype(w2_ref.dtype), w2_ref[...],
                preferred_element_type=jnp.float32)
    out_ref[...] = (y + b2_ref[...]).astype(out_ref.dtype)


def c51_head_forward(x, w1, b1, wq, bq, wv, bv, *, act_dim, num_atoms,
                     block_b=1024, compute_dtype=jnp.bfloat16,
                     out_dtype=jnp.float32):
    """Dueling C51 head:  relu(x@W1+b1) -> fused q/value heads -> (B, A, N)."""
    batch, feat = x.shape
    hidden = w1.shape[1]
    head = act_dim * num_atoms
    assert w1.shape == (feat, hidden)
    assert wq.shape == (hidden, head) and bq.shape == (head,)
    assert wv.shape == (hidden, num_atoms) and bv.shape == (num_atoms,)

    # ---- fold dueling combine (value + advantage - mean_a advantage) into the
    #      head weights; done in f32 before any bf16 cast ----
    wq3 = wq.reshape(hidden, act_dim, num_atoms)
    bq3 = bq.reshape(act_dim, num_atoms)
    w2 = (wq3 + (wv - wq3.mean(axis=1))[:, None, :]).reshape(hidden, head)
    b2 = (bq3 + (bv - bq3.mean(axis=0))[None, :]).reshape(1, head)

    # ---- pad the fused head to a full 128-lane output slab (zero columns) so
    #      every store is unmasked / lane-dense; MXU pass count is unchanged ----
    head_pad = _round_up(head, 128)
    w2 = jnp.pad(w2, ((0, 0), (0, head_pad - head)))
    b2 = jnp.pad(b2, ((0, 0), (0, head_pad - head)))

    # Matmul operands in compute_dtype (bf16 default: native MXU dtype on
    # v5e/v6e/v7x); biases and accumulation stay f32.
    w1c = w1.astype(compute_dtype)
    w2c = w2.astype(compute_dtype)
    b1r = b1.reshape(1, hidden).astype(jnp.float32)
    b2r = b2.astype(jnp.float32)

    # ---- batch tiling: cast x to compute_dtype (halves streamed HBM traffic),
    #      pad only to a multiple of 8 (bounded waste), ragged last tile via cdiv ----
    xp = x.astype(compute_dtype)
    b8 = _round_up(batch, 8)
    if b8 != batch:
        xp = jnp.pad(xp, ((0, b8 - batch), (0, 0)))

    tb = min(block_b, b8)
    # v7x occupancy: make sure the "parallel" batch axis has >= 2 grid steps so
    # both TensorCores get work (also gives the pipeline something to overlap).
    if b8 // tb < 2 and b8 >= 16:
        tb = _round_up(pl.cdiv(b8, 2), 8)
    grid = (pl.cdiv(b8, tb),)

    cost = pl.CostEstimate(
        flops=2 * batch * (feat * hidden + hidden * head_pad),
        transcendentals=0,
        bytes_accessed=(xp.size * xp.dtype.itemsize
                        + w1c.size * w1c.dtype.itemsize
                        + w2c.size * w2c.dtype.itemsize
                        + (b1r.size + b2r.size) * 4
                        + batch * head_pad * jnp.dtype(out_dtype).itemsize),
    )

    # NOTE: if a profile at large TB shows exposed DMA on the x/out streams, add
    # pipeline_mode=pl.Buffered(3) to the x in_spec / out_spec (tiles are tiny).
    out2d = pl.pallas_call(
        _c51_head_kernel,
        out_shape=jax.ShapeDtypeStruct((b8, head_pad), out_dtype),
        grid=grid,
        in_specs=[
            pl.BlockSpec((tb, feat), lambda i: (i, 0)),           # x: streamed per tile
            pl.BlockSpec((feat, hidden), lambda i: (0, 0)),       # W1: resident
            pl.BlockSpec((1, hidden), lambda i: (0, 0)),          # b1: resident
            pl.BlockSpec((hidden, head_pad), lambda i: (0, 0)),   # fused head W2: resident
            pl.BlockSpec((1, head_pad), lambda i: (0, 0)),        # fused head b2: resident
        ],
        out_specs=pl.BlockSpec((tb, head_pad), lambda i: (i, 0)),  # lane-dense 128-col slab
        compiler_params=pltpu.CompilerParams(
            dimension_semantics=("parallel",)),                   # megacore-shard batch axis
        cost_estimate=cost,
    )(xp, w1c, b1r, w2c, b2r)

    # Drop batch padding + zero head columns; 'b (a n) -> b a n' is a cheap
    # contiguous reshape outside the kernel.
    return out2d[:batch, :head].reshape(batch, act_dim, num_atoms)


def c51_head_reference(x, w1, b1, wq, bq, wv, bv, *, act_dim, num_atoms):
    h = jax.nn.relu(x @ w1 + b1)
    q = (h @ wq + bq).reshape(x.shape[0], act_dim, num_atoms)
    v = (h @ wv + bv)[:, None, :]
    return v + (q - q.mean(axis=1, keepdims=True))


if __name__ == "__main__":
    # Small, deterministic synthetic configuration (hidden=512 fixed by the module).
    batch, feat_dim, hidden, act_dim, num_atoms = 4, 64, 512, 3, 16

    key = jax.random.PRNGKey(0)
    k = jax.random.split(key, 4)

    # Deterministic parameter stand-ins for orthogonal init / zero bias (eval path).
    x = jax.random.normal(k[0], (batch, feat_dim), dtype=jnp.float32)
    w1 = jax.random.normal(k[1], (feat_dim, hidden), dtype=jnp.float32) * 0.05
    b1 = jnp.zeros((hidden,), dtype=jnp.float32)
    wq = jax.random.normal(k[2], (hidden, act_dim * num_atoms), dtype=jnp.float32) * 0.01
    bq = jnp.zeros((act_dim * num_atoms,), dtype=jnp.float32)
    wv = jax.random.normal(k[3], (hidden, num_atoms), dtype=jnp.float32) * 0.05
    bv = jnp.zeros((num_atoms,), dtype=jnp.float32)

    ref = c51_head_reference(x, w1, b1, wq, bq, wv, bv,
                             act_dim=act_dim, num_atoms=num_atoms)

    # f32-operand path (tight numerical check).
    out_f32 = c51_head_forward(x, w1, b1, wq, bq, wv, bv,
                               act_dim=act_dim, num_atoms=num_atoms,
                               compute_dtype=jnp.float32)
    out_f32 = jax.block_until_ready(out_f32)
    assert out_f32.shape == (batch, act_dim, num_atoms)
    assert jnp.allclose(out_f32, ref, atol=1e-3, rtol=1e-3), "f32 kernel mismatch"

    # Default bf16-operand path (native MXU dtype on v5e/v6e/v7x); looser tolerance.
    out = c51_head_forward(x, w1, b1, wq, bq, wv, bv,
                           act_dim=act_dim, num_atoms=num_atoms)
    out = jax.block_until_ready(out)
    assert out.shape == (batch, act_dim, num_atoms)
    assert jnp.allclose(out, ref, atol=5e-2, rtol=5e-2), "bf16 kernel mismatch"

    # TODO(synk): NoisyLinear training-mode noise sampling not implemented; kernel
    # matches the eval-path / plain nn.Linear semantics of C51Head.forward.
    print("KERNEL_OK")
</pallas_src>

<mosaic_0001>
module attributes {stable_mosaic.version = 11 : i64} {
  func.func @_c51_head_kernel(%arg0: i32, %arg1: memref<8x64xf32, #tpu.memory_space<vmem>>, %arg2: memref<64x512xf32, #tpu.memory_space<vmem>>, %arg3: memref<1x512xf32, #tpu.memory_space<vmem>>, %arg4: memref<512x128xf32, #tpu.memory_space<vmem>>, %arg5: memref<1x128xf32, #tpu.memory_space<vmem>>, %arg6: memref<8x128xf32, #tpu.memory_space<vmem>>) attributes {dimension_semantics = [#tpu.dimension_semantics<parallel>], iteration_bounds = array<i64: 1>, scalar_prefetch = 0 : i64, scratch_operands = 0 : i64, tpu.core_type = #tpu.core_type<tc>, window_params = [{transform_indices = @transform_0, window_bounds = array<i64: 8, 64>}, {pipeline_mode = #tpu.pipeline_mode<synchronous>, transform_indices = @transform_1, window_bounds = array<i64: 64, 512>}, {pipeline_mode = #tpu.pipeline_mode<synchronous>, transform_indices = @transform_2, window_bounds = array<i64: 1, 512>}, {pipeline_mode = #tpu.pipeline_mode<synchronous>, transform_indices = @transform_3, window_bounds = array<i64: 512, 128>}, {pipeline_mode = #tpu.pipeline_mode<synchronous>, transform_indices = @transform_4, window_bounds = array<i64: 1, 128>}, {transform_indices = @transform_5, window_bounds = array<i64: 8, 128>}]} {
    %c0 = arith.constant 0 : index
    %c0_0 = arith.constant 0 : index
    %0 = vector.load %arg1[%c0, %c0_0] : memref<8x64xf32, #tpu.memory_space<vmem>>, vector<8x64xf32>
    %c0_1 = arith.constant 0 : index
    %c0_2 = arith.constant 0 : index
    %1 = vector.load %arg2[%c0_1, %c0_2] : memref<64x512xf32, #tpu.memory_space<vmem>>, vector<64x512xf32>
    %cst = arith.constant dense<0.000000e+00> : vector<8x512xf32>
    %2 = tpu.matmul %0, %1, %cst {dimension_numbers = #tpu.dot_dimension_numbers<[1], [0], [0], [1], [0, 0, 1, 1], [], []>} : vector<8x64xf32>, vector<64x512xf32>, vector<8x512xf32> -> vector<8x512xf32>
    %c0_3 = arith.constant 0 : index
    %c0_4 = arith.constant 0 : index
    %3 = vector.load %arg3[%c0_3, %c0_4] : memref<1x512xf32, #tpu.memory_space<vmem>>, vector<1x512xf32>
    %4 = vector.broadcast %3 : vector<1x512xf32> to vector<8x512xf32>
    %5 = arith.addf %2, %4 : vector<8x512xf32>
    %cst_5 = arith.constant 0.000000e+00 : f32
    %6 = vector.broadcast %cst_5 : f32 to vector<8x512xf32>
    %7 = arith.maximumf %5, %6 : vector<8x512xf32>
    %c0_6 = arith.constant 0 : index
    %c0_7 = arith.constant 0 : index
    %8 = vector.load %arg4[%c0_6, %c0_7] : memref<512x128xf32, #tpu.memory_space<vmem>>, vector<512x128xf32>
    %cst_8 = arith.constant dense<0.000000e+00> : vector<8x128xf32>
    %9 = tpu.matmul %7, %8, %cst_8 {dimension_numbers = #tpu.dot_dimension_numbers<[1], [0], [0], [1], [0, 0, 1, 1], [], []>} : vector<8x512xf32>, vector<512x128xf32>, vector<8x128xf32> -> vector<8x128xf32>
    %c0_9 = arith.constant 0 : index
    %c0_10 = arith.constant 0 : index
    %10 = vector.load %arg5[%c0_9, %c0_10] : memref<1x128xf32, #tpu.memory_space<vmem>>, vector<1x128xf32>
    %11 = vector.broadcast %10 : vector<1x128xf32> to vector<8x128xf32>
    %12 = arith.addf %9, %11 : vector<8x128xf32>
    %c0_11 = arith.constant 0 : index
    %c0_12 = arith.constant 0 : index
    %13 = vector.load %arg6[%c0_11, %c0_12] : memref<8x128xf32, #tpu.memory_space<vmem>>, vector<8x128xf32>
    tpu.vector_store %arg6[%c0_11, %c0_12], %12 {strides = array<i32>} : memref<8x128xf32, #tpu.memory_space<vmem>>, vector<8x128xf32>,
    return
  }
  func.func @transform_0(%arg0: i32) -> (i32, i32) {
    %c0_i32 = arith.constant 0 : i32
    %c0_i32_0 = arith.constant 0 : i32
    return %arg0, %c0_i32 : i32, i32
  }
  func.func @transform_1(%arg0: i32) -> (i32, i32) {
    %c0_i32 = arith.constant 0 : i32
    %c0_i32_0 = arith.constant 0 : i32
    %c0_i32_1 = arith.constant 0 : i32
    return %c0_i32, %c0_i32_0 : i32, i32
  }
  func.func @transform_2(%arg0: i32) -> (i32, i32) {
    %c0_i32 = arith.constant 0 : i32
    %c0_i32_0 = arith.constant 0 : i32
    %c0_i32_1 = arith.constant 0 : i32
    return %c0_i32, %c0_i32_0 : i32, i32
  }
  func.func @transform_3(%arg0: i32) -> (i32, i32) {
    %c0_i32 = arith.constant 0 : i32
    %c0_i32_0 = arith.constant 0 : i32
    %c0_i32_1 = arith.constant 0 : i32
    return %c0_i32, %c0_i32_0 : i32, i32
  }
  func.func @transform_4(%arg0: i32) -> (i32, i32) {
    %c0_i32 = arith.constant 0 : i32
    %c0_i32_0 = arith.constant 0 : i32
    %c0_i32_1 = arith.constant 0 : i32
    return %c0_i32, %c0_i32_0 : i32, i32
  }
  func.func @transform_5(%arg0: i32) -> (i32, i32) {
    %c0_i32 = arith.constant 0 : i32
    %c0_i32_0 = arith.constant 0 : i32
    return %arg0, %c0_i32 : i32, i32
  }
}

</mosaic_0001>

<bundles_post_ra>
// kernel: tpu_custom_call.1
= control target key start
LH: loop header
LB: loop body
LE: loop exit
PB: predicated region body
PF: predicated region fallthrough
CT: control target
= control target key end

     0   :  { %10 = vsyncpa [#allocation3], 0  ;;  %s860_s0 = inlined_call_operand.hbm [shape: f32[8,64], index: 0, kind: input, shape index: {}]   ;;  %s861_s1 = inlined_call_operand.hbm [shape: f32[64,512], index: 1, kind: input, shape index: {}]   ;;  %s862_s2 = inlined_call_operand.vmem [shape: f32[1,512], index: 2, kind: input, shape index: {}]   ;;  %s863_s3 = inlined_call_operand.hbm [shape: f32[512,128], index: 3, kind: input, shape index: {}]   ;;  %s864_s4 = inlined_call_operand.vmem [shape: f32[1,128], index: 4, kind: input, shape index: {}]   ;;  %s865_s5 = inlined_call_operand.hbm [shape: f32[8,128], index: 5, kind: output, shape index: {}]  }
   0x1   :  { %11 = vsyncpa [#allocation6], 0 }
   0x2   :  { %12 = vsyncpa [#allocation4], 0  ;;  %s765_s18 = smov [#allocation5]   ;;  %s671_s22 = scalar_lea.hbm %s861_s1, 4096 }
   0x3   :  { %s28_s19 = sshll.u32 %s765_s18, 4  ;;  %p672_p0 = scmp.ne.s32.totalorder %s861_s1, %s671_s22  ;;  %s29_s19 = int_to_ptr.vmem [resolvable:$true] %s28_s19 }
   0x4   :  { %p675_p1 = scmp.lt.u32.totalorder %s671_s22, %s861_s1 }
   0x6   :  { %p677_p2 = pnand %p675_p1, %p672_p0 }
   0x8   :  { %680 = shalt.err (!%p677_p2)
}
   0x9   :  { %s681_s27 = scalar_lea.vmem %s29_s19, 4096  ;;  %p686_p4 = scmp.lt.s32.totalorder %s29_s19, %s29_s19 }
   0xa   :  { %p682_p3 = scmp.ne.s32.totalorder %s29_s19, %s681_s27  ;;  %p687_p5 = scmp.lt.s32.totalorder %s681_s27, %s681_s27 }
   0xc   :  { %p688_p6 = por %p687_p5, %p686_p4 }
   0xe   :  { %p689_p7 = pnand %p688_p6, %p682_p3 }
  0x10   :  { %692 = shalt.err (!%p689_p7)
}
  0x11   :  { %s766_s28 = smov 512   ;;  %s767_s29 = smov 32  }
  0x12   :  { %34 = dma.hbm_to_vmem [thread:$0]  %s861_s1, 4096, %s29_s19, [#allocation6], %s766_s28, %s766_s28, %s767_s29  }
  0x13   :  { %s768_s7 = smov [#allocation2]   ;;  %s769_s9 = smov [#allocation7]  }
  0x14   :  { %s19_s8 = sshll.u32 %s768_s7, 4  ;;  %s42_s10 = sshll.u32 %s769_s9, 4  ;;  %s20_s8 = int_to_ptr.vmem [resolvable:$true] %s19_s8  ;;  %s43_s10 = int_to_ptr.vmem [resolvable:$true] %s42_s10 }
  0x15   :  { %s693_s13 = scalar_lea.hbm %s860_s0, 128 }
  0x16   :  { %p694_p8 = scmp.ne.s32.totalorder %s860_s0, %s693_s13  ;;  %p697_p9 = scmp.lt.u32.totalorder %s693_s13, %s860_s0 }
  0x18   :  { %p699_p10 = pnand %p697_p9, %p694_p8 }
  0x1a   :  { %702 = shalt.err (!%p699_p10)
}
  0x1b   :  { %s703_s1 = scalar_lea.vmem %s20_s8, 128  ;;  %p708_p12 = scmp.lt.s32.totalorder %s20_s8, %s20_s8 }
  0x1c   :  { %p704_p11 = scmp.ne.s32.totalorder %s20_s8, %s703_s1  ;;  %p709_p13 = scmp.lt.s32.totalorder %s703_s1, %s703_s1 }
  0x1e   :  { %p710_p0 = por %p709_p13, %p708_p12 }
  0x20   :  { %p711_p1 = pnand %p710_p0, %p704_p11 }
  0x22   :  { %714 = shalt.err (!%p711_p1)
}
  0x23   :  { %22 = dma.hbm_to_vmem [thread:$0]  %s860_s0, 128, %s20_s8, [#allocation3]  }
  0x24   :  { %s715_s22 = scalar_lea.hbm %s863_s3, 8192 }
  0x25   :  { %p716_p2 = scmp.ne.s32.totalorder %s863_s3, %s715_s22  ;;  %p719_p3 = scmp.lt.u32.totalorder %s715_s22, %s863_s3 }
  0x27   :  { %p721_p4 = pnand %p719_p3, %p716_p2 }
  0x29   :  { %724 = shalt.err (!%p721_p4)
}
  0x2a   :  { %s725_s27 = scalar_lea.vmem %s43_s10, 8192  ;;  %p730_p6 = scmp.lt.s32.totalorder %s43_s10, %s43_s10 }
  0x2b   :  { %p726_p5 = scmp.ne.s32.totalorder %s43_s10, %s725_s27  ;;  %p731_p7 = scmp.lt.s32.totalorder %s725_s27, %s725_s27 }
  0x2d   :  { %p732_p8 = por %p731_p7, %p730_p6 }
  0x2f   :  { %p733_p9 = pnand %p732_p8, %p726_p5 }
  0x31   :  { %736 = shalt.err (!%p733_p9)
}
  0x32   :  { %s770_s0 = smov 128   ;;  %s771_s28 = smov 8  }
  0x33   :  { %48 = dma.hbm_to_vmem [thread:$0]  %s863_s3, 8192, %s43_s10, [#allocation6], %s770_s0, %s770_s0, %s771_s28  }
  0x34   :  { %759 = dma.done.wait [#allocation3], 128  }
  0x35   :  { %760 = vsyncadd [#allocation3], 4294967168 }
  0x36   :  { %761 = dma.done.wait [#allocation6], 12288  }
  0x37   :  { %762 = vsyncadd [#allocation6], 4294955008  ;;  %v772_v0 = vmov 0.0   ;;  %v62_v1 = vld [vmem:[#allocation5 + $0x8] sm:$0xff]  ;;  %v64_v3 = vld [vmem:[#allocation5 + $0x18] sm:$0xff]  ;;  %vm115_vm0 = vcmask 523264  }
  0x38   :  { %183 = vmatprep.mubr.f32.mxu0 %v772_v0  ;;  %254 = vmatprep.mubr.f32.mxu1 %v772_v0  ;;  %v66_v2 = vld [vmem:[#allocation5 + $0x28] sm:$0xff]  ;;  %v68_v5 = vld [vmem:[#allocation5 + $0x38] sm:$0xff]  ;;  %v61_v6 = vld [vmem:[#allocation5] sm:$0xff]  ;;  %s773_s8 = smov [#allocation8]  }
  0x39   :  { %v566_v4 = vpack.c.bf16 %v66_v2, %v62_v1  ;;  %v65_v7 = vld [vmem:[#allocation5 + $0x20] sm:$0xff]  ;;  %v582_v8 = vpack.c.bf16 %v68_v5, %v64_v3  ;;  %v63_v10 = vld [vmem:[#allocation5 + $0x10] sm:$0xff]  ;;  %v70_v12 = vld [vmem:[#allocation5 + $0x48] sm:$0xff]  ;;  %s483_s9 = sshll.u32 %s773_s8, 4  ;;  %s484_s9 = int_to_ptr.vmem [resolvable:$true] %s483_s9 }
  0x3a   :  { %v568_v9 = vpack.c.bf16 %v65_v7, %v61_v6  ;;  %v67_v11 = vld [vmem:[#allocation5 + $0x30] sm:$0xff]  ;;  %v74_v14 = vld [vmem:[#allocation5 + $0x68] sm:$0xff]  ;;  %v72_v15 = vld [vmem:[#allocation5 + $0x58] sm:$0xff]  ;;  %s737_s10 = scalar_lea.vmem %s484_s9, 128  ;;  %p742_p11 = scmp.lt.s32.totalorder %s484_s9, %s484_s9 }
  0x3b   :  { %567 = vmatprep.subr.bf16.mxu0 %v566_v4  ;;  %v584_v13 = vpack.c.bf16 %v67_v11, %v63_v10  ;;  %v76_v16 = vld [vmem:[#allocation5 + $0x78] sm:$0xff]  ;;  %583 = vmatprep.subr.bf16.mxu1 %v582_v8  ;;  %v570_v17 = vpack.c.bf16 %v74_v14, %v70_v12  ;;  %v69_v19 = vld [vmem:[#allocation5 + $0x40] sm:$0xff]  ;;  %v71_v21 = vld [vmem:[#allocation5 + $0x50] sm:$0xff]  ;;  %p738_p10 = scmp.ne.s32.totalorder %s484_s9, %s737_s10  ;;  %p743_p12 = scmp.lt.s32.totalorder %s737_s10, %s737_s10 }
  0x3c   :  { %569 = vmatpush1.bf16.msra.mxu0 %v568_v9  ;;  %v586_v18 = vpack.c.bf16 %v76_v16, %v72_v15  ;;  %v73_v20 = vld [vmem:[#allocation5 + $0x60] sm:$0xff]  ;;  %v75_v23 = vld [vmem:[#allocation5 + $0x70] sm:$0xff]  ;;  %v78_v24 = vld [vmem:[#allocation5 + $0x88] sm:$0xff] }
  0x3d   :  { %585 = vmatpush1.bf16.msra.mxu1 %v584_v13  ;;  %v572_v22 = vpack.c.bf16 %v73_v20, %v69_v19  ;;  %v82_v25 = vld [vmem:[#allocation5 + $0xa8] sm:$0xff]  ;;  %571 = vmatprep.subr.bf16.mxu0 %v570_v17  ;;  %v588_v26 = vpack.c.bf16 %v75_v23, %v71_v21  ;;  %v80_v28 = vld [vmem:[#allocation5 + $0x98] sm:$0xff]  ;;  %v77_v30 = vld [vmem:[#allocation5 + $0x80] sm:$0xff]  ;;  %p744_p13 = por %p743_p12, %p742_p11 }
  0x3e   :  { %587 = vmatprep.subr.bf16.mxu1 %v586_v18  ;;  %v574_v27 = vpack.c.bf16 %v82_v25, %v78_v24  ;;  %v84_v29 = vld [vmem:[#allocation5 + $0xb8] sm:$0xff]  ;;  %v81_v32 = vld [vmem:[#allocation5 + $0xa0] sm:$0xff]  ;;  %v79_v33 = vld [vmem:[#allocation5 + $0x90] sm:$0xff] }
  0x3f   :  { %v590_v31 = vpack.c.bf16 %v84_v29, %v80_v28  ;;  %v83_v34 = vld [vmem:[#allocation5 + $0xb0] sm:$0xff]  ;;  %v576_v35 = vpack.c.bf16 %v81_v32, %v77_v30  ;;  %v86_v36 = vld [vmem:[#allocation5 + $0xc8] sm:$0xff]  ;;  %v88_v38 = vld [vmem:[#allocation5 + $0xd8] sm:$0xff]  ;;  %p745_p0 = pnand %p744_p13, %p738_p10 }
  0x40   :  { %573 = vmatpush1.bf16.msra.mxu0 %v572_v22  ;;  %v90_v37 = vld [vmem:[#allocation5 + $0xe8] sm:$0xff]  ;;  %v592_v39 = vpack.c.bf16 %v83_v34, %v79_v33  ;;  %v92_v41 = vld [vmem:[#allocation5 + $0xf8] sm:$0xff]  ;;  %v85_v42 = vld [vmem:[#allocation5 + $0xc0] sm:$0xff] }
  0x41   :  { %589 = vmatpush1.bf16.msra.mxu1 %v588_v26  ;;  %575 = vmatprep.subr.bf16.mxu0 %v574_v27  ;;  %v578_v40 = vpack.c.bf16 %v90_v37, %v86_v36  ;;  %v89_v43 = vld [vmem:[#allocation5 + $0xe0] sm:$0xff]  ;;  %v594_v44 = vpack.c.bf16 %v92_v41, %v88_v38  ;;  %v87_v45 = vld [vmem:[#allocation5 + $0xd0] sm:$0xff]  ;;  %v282_v48 = vld [vmem:[#allocation7 + $0x88] sm:$0xff] }
  0x42   :  { %591 = vmatprep.subr.bf16.mxu1 %v590_v31  ;;  %v91_v46 = vld [vmem:[#allocation5 + $0xf0] sm:$0xff]  ;;  %v281_v47 = vld [vmem:[#allocation7 + $0x80] sm:$0xff]  ;;  %v580_v50 = vpack.c.bf16 %v89_v43, %v85_v42  ;;  %v314_v51 = vld [vmem:[#allocation7 + $0x188] sm:$0xff] }
  0x43   :  { %v313_v49 = vld [vmem:[#allocation7 + $0x180] sm:$0xff]  ;;  %v596_v52 = vpack.c.bf16 %v91_v46, %v87_v45  ;;  %v598_v53 = vpack.c.bf16 %v282_v48, %v281_v47  ;;  %v266_v55 = vld [vmem:[#allocation7 + $0x8] sm:$0xff]  ;;  %v283_v59 = vld [vmem:[#allocation7 + $0x90] sm:$0xff] }
  0x44   :  { %577 = vmatpush1.bf16.msra.mxu0 %v576_v35  ;;  %v265_v54 = vld [vmem:[#allocation7] sm:$0xff]  ;;  %v630_v57 = vpack.c.bf16 %v314_v51, %v313_v49  ;;  %v298_v58 = vld [vmem:[#allocation7 + $0x108] sm:$0xff]  ;;  %v284_v60 = vld [vmem:[#allocation7 + $0x98] sm:$0xff] }
  0x45   :  { %593 = vmatpush1.bf16.msra.mxu1 %v592_v39  ;;  %579 = vmatprep.subr.bf16.mxu0 %v578_v40  ;;  %v297_v56 = vld [vmem:[#allocation7 + $0x100] sm:$0xff]  ;;  %v315_v61 = vld [vmem:[#allocation7 + $0x190] sm:$0xff]  ;;  %v316_v62 = vld [vmem:[#allocation7 + $0x198] sm:$0xff]  ;;  %v600_v0 = vpack.c.bf16 %v266_v55, %v265_v54  ;;  %v602_v2 = vpack.c.bf16 %v284_v60, %v283_v59 }
  0x46   :  { %595 = vmatprep.subr.bf16.mxu1 %v594_v44  ;;  %v60_v63 = vld [vmem:[#allocation2] sm:$0xff]  ;;  %v632_v1 = vpack.c.bf16 %v298_v58, %v297_v56  ;;  %v267_v3 = vld [vmem:[#allocation7 + $0x10] sm:$0xff]  ;;  %v634_v6 = vpack.c.bf16 %v316_v62, %v315_v61  ;;  %v285_v8 = vld [vmem:[#allocation7 + $0xa0] sm:$0xff] }
  0x47   :  { %v268_v4 = vld [vmem:[#allocation7 + $0x18] sm:$0xff]  ;;  %v299_v5 = vld [vmem:[#allocation7 + $0x110] sm:$0xff]  ;;  %v286_v9 = vld [vmem:[#allocation7 + $0xa8] sm:$0xff] }
  0x48   :  { %581 = vmatpush1.bf16.msra.mxu0 %v580_v50  ;;  %v300_v7 = vld [vmem:[#allocation7 + $0x118] sm:$0xff]  ;;  %v317_v10 = vld [vmem:[#allocation7 + $0x1a0] sm:$0xff]  ;;  %v318_v11 = vld [vmem:[#allocation7 + $0x1a8] sm:$0xff]  ;;  %v604_v12 = vpack.c.bf16 %v268_v4, %v267_v3  ;;  %v606_v14 = vpack.c.bf16 %v286_v9, %v285_v8 }
  0x49   :  { %597 = vmatpush1.bf16.msra.mxu1 %v596_v52  ;;  %599 = vmatprep.subr.bf16.mxu0 %v598_v53  ;;  %v636_v13 = vpack.c.bf16 %v300_v7, %v299_v5  ;;  %v269_v15 = vld [vmem:[#allocation7 + $0x20] sm:$0xff]  ;;  %v270_v16 = vld [vmem:[#allocation7 + $0x28] sm:$0xff]  ;;  %v638_v18 = vpack.c.bf16 %v318_v11, %v317_v10  ;;  %v287_v20 = vld [vmem:[#allocation7 + $0xb0] sm:$0xff] }
  0x4a   :  { %631 = vmatprep.subr.bf16.mxu1 %v630_v57  ;;  %v301_v17 = vld [vmem:[#allocation7 + $0x120] sm:$0xff]  ;;  %v302_v19 = vld [vmem:[#allocation7 + $0x128] sm:$0xff]  ;;  %v288_v21 = vld [vmem:[#allocation7 + $0xb8] sm:$0xff]  ;;  %v608_v24 = vpack.c.bf16 %v270_v16, %v269_v15 }
  0x4b   :  { %493 = vmatmul.mubr.msk.f32.vlgmr.msra.gmra.mrb[0].mxu0 %vm115_vm0, %v60_v63  ;;  %v319_v22 = vld [vmem:[#allocation7 + $0x1b0] sm:$0xff]  ;;  %v320_v23 = vld [vmem:[#allocation7 + $0x1b8] sm:$0xff]  ;;  %v640_v25 = vpack.c.bf16 %v302_v19, %v301_v17  ;;  %v610_v26 = vpack.c.bf16 %v288_v21, %v287_v20  ;;  %v289_v32 = vld [vmem:[#allocation7 + $0xc0] sm:$0xff] }
  0x4c   :  { %494 = vmatmul.mubr.msk.f32.vlgmr.msra.gmra.mrb[0].mxu1 %vm115_vm0, %v60_v63  ;;  %601 = vmatpush3.bf16.msra.mxu0 %v600_v0  ;;  %v271_v27 = vld [vmem:[#allocation7 + $0x30] sm:$0xff]  ;;  %v272_v28 = vld [vmem:[#allocation7 + $0x38] sm:$0xff]  ;;  %v642_v30 = vpack.c.bf16 %v320_v23, %v319_v22  ;;  %v290_v33 = vld [vmem:[#allocation7 + $0xc8] sm:$0xff] }
  0x4d   :  { %633 = vmatpush3.bf16.msra.mxu1 %v632_v1  ;;  %603 = vmatprep.subr.bf16.mxu0 %v602_v2  ;;  %v303_v29 = vld [vmem:[#allocation7 + $0x130] sm:$0xff]  ;;  %v304_v31 = vld [vmem:[#allocation7 + $0x138] sm:$0xff]  ;;  %v321_v34 = vld [vmem:[#allocation7 + $0x1c0] sm:$0xff]  ;;  %v612_v36 = vpack.c.bf16 %v272_v28, %v271_v27  ;;  %v614_v38 = vpack.c.bf16 %v290_v33, %v289_v32 }
  0x4e   :  { %635 = vmatprep.subr.bf16.mxu1 %v634_v6  ;;  %v322_v35 = vld [vmem:[#allocation7 + $0x1c8] sm:$0xff]  ;;  %v644_v37 = vpack.c.bf16 %v304_v31, %v303_v29  ;;  %v273_v39 = vld [vmem:[#allocation7 + $0x40] sm:$0xff]  ;;  %v291_v44 = vld [vmem:[#allocation7 + $0xd0] sm:$0xff] }
  0x4f   :  { %v274_v40 = vld [vmem:[#allocation7 + $0x48] sm:$0xff]  ;;  %v305_v41 = vld [vmem:[#allocation7 + $0x140] sm:$0xff]  ;;  %v646_v42 = vpack.c.bf16 %v322_v35, %v321_v34  ;;  %v292_v45 = vld [vmem:[#allocation7 + $0xd8] sm:$0xff] }
  0x50   :  { %605 = vmatpush3.bf16.msra.mxu0 %v604_v12  ;;  %v306_v43 = vld [vmem:[#allocation7 + $0x148] sm:$0xff]  ;;  %v323_v46 = vld [vmem:[#allocation7 + $0x1d0] sm:$0xff]  ;;  %v324_v47 = vld [vmem:[#allocation7 + $0x1d8] sm:$0xff]  ;;  %v616_v48 = vpack.c.bf16 %v274_v40, %v273_v39  ;;  %v618_v50 = vpack.c.bf16 %v292_v45, %v291_v44 }
  0x51   :  { %637 = vmatpush3.bf16.msra.mxu1 %v636_v13  ;;  %607 = vmatprep.subr.bf16.mxu0 %v606_v14  ;;  %v648_v49 = vpack.c.bf16 %v306_v43, %v305_v41  ;;  %v275_v51 = vld [vmem:[#allocation7 + $0x50] sm:$0xff]  ;;  %v276_v52 = vld [vmem:[#allocation7 + $0x58] sm:$0xff]  ;;  %v650_v54 = vpack.c.bf16 %v324_v47, %v323_v46  ;;  %v293_v56 = vld [vmem:[#allocation7 + $0xe0] sm:$0xff] }
  0x52   :  { %639 = vmatprep.subr.bf16.mxu1 %v638_v18  ;;  %v307_v53 = vld [vmem:[#allocation7 + $0x150] sm:$0xff]  ;;  %v308_v55 = vld [vmem:[#allocation7 + $0x158] sm:$0xff]  ;;  %v294_v57 = vld [vmem:[#allocation7 + $0xe8] sm:$0xff]  ;;  %v620_v60 = vpack.c.bf16 %v276_v52, %v275_v51  ;;  %v95_v18 = vlaneseq }
  0x53   :  { %v325_v58 = vld [vmem:[#allocation7 + $0x1e0] sm:$0xff]  ;;  %v326_v59 = vld [vmem:[#allocation7 + $0x1e8] sm:$0xff]  ;;  %v652_v61 = vpack.c.bf16 %v308_v55, %v307_v53  ;;  %v622_v62 = vpack.c.bf16 %v294_v57, %v293_v56  ;;  %v295_v6 = vld [vmem:[#allocation7 + $0xf0] sm:$0xff] }
  0x54   :  { %609 = vmatpush3.bf16.msra.mxu0 %v608_v24  ;;  %v654_v63 = vpack.c.bf16 %v326_v59, %v325_v58  ;;  %v277_v0 = vld [vmem:[#allocation7 + $0x60] sm:$0xff]  ;;  %v278_v1 = vld [vmem:[#allocation7 + $0x68] sm:$0xff]  ;;  %v296_v7 = vld [vmem:[#allocation7 + $0xf8] sm:$0xff]  ;;  %v96_v19 = vshrl.u32 %v95_v18, 7 }
  0x55   :  { %641 = vmatpush3.bf16.msra.mxu1 %v640_v25  ;;  %611 = vmatprep.subr.bf16.mxu0 %v610_v26  ;;  %v309_v2 = vld [vmem:[#allocation7 + $0x160] sm:$0xff]  ;;  %v624_v3 = vpack.c.bf16 %v278_v1, %v277_v0  ;;  %v310_v4 = vld [vmem:[#allocation7 + $0x168] sm:$0xff]  ;;  %v327_v8 = vld [vmem:[#allocation7 + $0x1f0] sm:$0xff]  ;;  %v626_v9 = vpack.c.bf16 %v296_v7, %v295_v6 }
  0x56   :  { %643 = vmatprep.subr.bf16.mxu1 %v642_v30  ;;  %v656_v5 = vpack.c.bf16 %v310_v4, %v309_v2  ;;  %v328_v10 = vld [vmem:[#allocation7 + $0x1f8] sm:$0xff]  ;;  %v279_v11 = vld [vmem:[#allocation7 + $0x70] sm:$0xff]  ;;  %v97_v20 = vsub.s32 0, %v96_v19  ;;  %v105_v22 = vsub.s32 2, %v96_v19  ;;  %v101_v23 = vsub.s32 1, %v96_v19 }
  0x57   :  { %v280_v12 = vld [vmem:[#allocation7 + $0x78] sm:$0xff]  ;;  %v658_v13 = vpack.c.bf16 %v328_v10, %v327_v8  ;;  %v311_v15 = vld [vmem:[#allocation7 + $0x170] sm:$0xff]  ;;  %v109_v24 = vsub.s32 3, %v96_v19 }
  0x58   :  { %613 = vmatpush3.bf16.msra.mxu0 %v612_v36  ;;  %v628_v14 = vpack.c.bf16 %v280_v12, %v279_v11  ;;  %v312_v16 = vld [vmem:[#allocation7 + $0x178] sm:$0xff] }
  0x59   :  { %645 = vmatpush3.bf16.msra.mxu1 %v644_v37  ;;  %615 = vmatprep.subr.bf16.mxu0 %v614_v38  ;;  %v660_v17 = vpack.c.bf16 %v312_v16, %v311_v15  ;;  %v93_v21 = vld [vmem:[%s862_s2] sm:$0xf] }
  0x5a   :  { %647 = vmatprep.subr.bf16.mxu1 %v646_v42  ;;  %v98_v25 = vrot.slane %v93_v21, %v97_v20  ;;  %v106_v26 = vrot.slane %v93_v21, %v105_v22  ;;  %v102_v27 = vrot.slane %v93_v21, %v101_v23  ;;  %v110_v28 = vrot.slane %v93_v21, %v109_v24  ;;  %v495_v43 = vld [vmem:[%s864_s4] ss:$0 sm:$0xff] }
  0x5c   :  { %617 = vmatpush3.bf16.msra.mxu0 %v616_v48 }
  0x5d   :  { %649 = vmatpush3.bf16.msra.mxu1 %v648_v49  ;;  %619 = vmatprep.subr.bf16.mxu0 %v618_v50 }
  0x5e   :  { %651 = vmatprep.subr.bf16.mxu1 %v650_v54 }
  0x60   :  { %621 = vmatpush3.bf16.msra.mxu0 %v620_v60 }
  0x61   :  { %653 = vmatpush3.bf16.msra.mxu1 %v652_v61  ;;  %623 = vmatprep.subr.bf16.mxu0 %v622_v62 }
  0x62   :  { %655 = vmatprep.subr.bf16.mxu1 %v654_v63 }
  0x64   :  { %625 = vmatpush3.bf16.msra.mxu0 %v624_v3 }
  0x65   :  { %657 = vmatpush3.bf16.msra.mxu1 %v656_v5  ;;  %627 = vmatprep.subr.bf16.mxu0 %v626_v9 }
  0x66   :  { %659 = vmatprep.subr.bf16.mxu1 %v658_v13 }
  0x68   :  { %629 = vmatpush3.bf16.msra.mxu0 %v628_v14 }
  0x69   :  { %661 = vmatpush3.bf16.msra.mxu1 %v660_v17 }
 0x11e   :  { %v185_v29 = vpop.f32.mrb[0].mxu0 }
 0x11f   :  { %v186_v30 = vadd.f32 %v185_v29, %v98_v25  ;;  %v256_v31 = vpop.f32.mrb[0].mxu1  ;;  %v187_v32 = vpop.f32.mrb[1].mxu0 }
 0x120   :  { %v257_v33 = vadd.f32 %v256_v31, %v106_v26  ;;  %v188_v34 = vadd.f32 %v187_v32, %v102_v27  ;;  %v258_v35 = vpop.f32.mrb[1].mxu1 }
 0x121   :  { %v259_v36 = vadd.f32 %v258_v35, %v110_v28  ;;  %v261_v39 = vmax.f32 %v186_v30, 0.0 }
 0x122   :  { %v263_v37 = vmax.f32 %v257_v33, 0.0  ;;  %v262_v38 = vmax.f32 %v188_v34, 0.0 }
 0x123   :  { %v264_v40 = vmax.f32 %v259_v36, 0.0 }
 0x124   :  { %400 = vmatprep.mubr.f32.mxu0 %v262_v38 }
 0x125   :  { %470 = vmatprep.mubr.f32.mxu1 %v264_v40  ;;  %401 = vmatmul.mubr.f32.vlgmr.msra.gmra.mrb[2].mxu0 %v261_v39 }
 0x126   :  { %471 = vmatmul.mubr.f32.vlgmr.msra.gmra.mrb[2].mxu1 %v263_v37 }
 0x1f8   :  { %v528_v41 = vpop.f32.mrb[2].mxu0 }
 0x1f9   :  { %v563_v42 = vpop.f32.mrb[2].mxu1  ;;  %v529_v44 = vpop.f32.mrb[3].mxu0 }
 0x1fa   :  { %v530_v45 = vadd.f32 %v529_v44, %v528_v41  ;;  %v564_v46 = vpop.f32.mrb[3].mxu1 }
 0x1fb   :  { %v565_v47 = vadd.f32 %v564_v46, %v563_v42 }
 0x1fc   :  { %v403_v48 = vadd.f32 %v530_v45, %v495_v43 }
 0x1fe   :  { %v473_v49 = vadd.f32 %v565_v47, %v403_v48 }
 0x200   :  { %476 = vst [vmem:[#allocation8] sm:$0xff] %v473_v49 }
 0x201   :  { %748 = shalt.err (!%p745_p0)
}
 0x202   :  { %s749_s4 = scalar_lea.hbm %s865_s5, 128 }
 0x203   :  { %p750_p1 = scmp.ne.s32.totalorder %s865_s5, %s749_s4  ;;  %p753_p2 = scmp.lt.u32.totalorder %s749_s4, %s865_s5 }
 0x205   :  { %p755_p3 = pnand %p753_p2, %p750_p1 }
 0x207   :  { %758 = shalt.err (!%p755_p3)
}
 0x208   :  { %486 = dma.vmem_to_hbm [thread:$0]  %s484_s9, 128, %s865_s5, [#allocation4]  }
 0x209   :  { %763 = dma.done.wait [#allocation4], 128  }
 0x20a   :  { %764 = vsyncadd [#allocation4], 4294967168 }
 0x20b   :  { %490 = vsyncpa [#allocation3], 1 }
 0x20c   :  { %491 = vsyncpa [#allocation6], 1 }
 0x20d   :  { %492 = vsyncpa [#allocation4], 1 }

</bundles_post_ra>
